<compile_context>
chip_gen: v6e
topology: v6e:2x2x1
jax: 0.10.0
libtpu: 0.0.40
codegen_flags: <defaults>
</compile_context>

<pallas_src>
import numpy as np

import jax
import jax.numpy as jnp
from jax.experimental import pallas as pl
from jax.experimental.pallas import tpu as pltpu


def make_kernel(k):
    """Same semantics as the PyTorch make_kernel: outer product + normalize."""
    k = np.asarray(k, dtype=np.float32)
    if k.ndim == 1:
        k = k[None, :] * k[:, None]
    k = k / k.sum()
    return k


def _sep_body(col_taps, row_taps, geom):
    """Separable blur: vertical pass then horizontal pass. Taps baked as consts."""
    (b, h, w, hp, wp, ho, wo, dh0, sh0, ch, dw0, sw0, cw) = geom
    # upfirdn applies a true convolution -> flip the taps, then correlate.
    cf = [float(t) for t in col_taps[::-1]]
    rf = [float(t) for t in row_taps[::-1]]

    def kernel(x_ref, o_ref, xp_ref, tmp_ref):
        # Fused zero-pad / crop into VMEM scratch (all slice bounds are static).
        xp_ref[...] = jnp.zeros_like(xp_ref)
        xp_ref[:, dh0:dh0 + ch, dw0:dw0 + cw] = (
            x_ref[:, sh0:sh0 + ch, sw0:sw0 + cw].astype(jnp.float32))

        # Vertical (H) pass -> (B, Ho, Wp) in VMEM scratch.
        v = cf[0] * xp_ref[:, 0:ho, :]
        for i in range(1, len(cf)):
            v = v + cf[i] * xp_ref[:, i:i + ho, :]
        tmp_ref[...] = v

        # Horizontal (W) pass -> (B, Ho, Wo).
        acc = rf[0] * tmp_ref[:, :, 0:wo]
        for j in range(1, len(rf)):
            acc = acc + rf[j] * tmp_ref[:, :, j:j + wo]
        o_ref[...] = acc.astype(o_ref.dtype)

    return kernel


def _dense_body(k2d, geom):
    """Fallback for explicitly 2-D (non-separable) kernels."""
    (b, h, w, hp, wp, ho, wo, dh0, sh0, ch, dw0, sw0, cw) = geom
    kf = np.flip(np.asarray(k2d, np.float32), (0, 1))
    kh, kw = kf.shape

    def kernel(x_ref, o_ref, xp_ref):
        xp_ref[...] = jnp.zeros_like(xp_ref)
        xp_ref[:, dh0:dh0 + ch, dw0:dw0 + cw] = (
            x_ref[:, sh0:sh0 + ch, sw0:sw0 + cw].astype(jnp.float32))
        acc = None
        for i in range(kh):
            for j in range(kw):
                term = float(kf[i, j]) * xp_ref[:, i:i + ho, j:j + wo]
                acc = term if acc is None else acc + term
        o_ref[...] = acc.astype(o_ref.dtype)

    return kernel


def _pick_block_images(nc, per_image_bytes, budget_bytes=8 << 20):
    """Largest divisor of nc within a conservative VMEM budget (safe on v5e/v6e/v7x)."""
    b_cap = int(max(1, min(nc, budget_bytes // max(per_image_bytes, 1))))
    if nc >= 2:
        # Keep at least 2 grid steps so both v7x TensorCores get work.
        b_cap = min(b_cap, max(1, nc // 2))
    for d in range(b_cap, 0, -1):
        if nc % d == 0:
            return d
    return 1


def blur_upfirdn2d(x, col_taps, row_taps, k2d, pad):
    """upfirdn2d with up=down=1: (fused) spatial pad then true 2-D FIR convolution."""
    n, c, h, w = x.shape
    pad0, pad1 = int(pad[0]), int(pad[1])
    if col_taps is not None:
        kh, kw = len(col_taps), len(row_taps)
    else:
        kh, kw = k2d.shape

    hp = h + pad0 + pad1
    wp = w + pad0 + pad1
    ho = hp - kh + 1
    wo = wp - kw + 1
    assert ho > 0 and wo > 0, "blur output must be non-empty"

    # Fused-pad placement (negative pads crop the input).
    dh0, sh0 = max(pad0, 0), max(-pad0, 0)
    dw0, sw0 = max(pad0, 0), max(-pad0, 0)
    ch = h - sh0 - max(-pad1, 0)
    cw = w - sw0 - max(-pad1, 0)
    assert ch > 0 and cw > 0, "pads crop away the whole input"

    nc = n * c
    isize = jnp.dtype(x.dtype).itemsize
    # double-buffered in/out blocks + f32 scratches, per image
    per_img = 2 * (h * w + ho * wo) * isize + (hp * wp + ho * wp) * 4
    b = _pick_block_images(nc, per_img)

    geom = (b, h, w, hp, wp, ho, wo, dh0, sh0, ch, dw0, sw0, cw)
    if col_taps is not None:
        body = _sep_body(col_taps, row_taps, geom)
        scratch_shapes = [pltpu.VMEM((b, hp, wp), jnp.float32),
                          pltpu.VMEM((b, ho, wp), jnp.float32)]
    else:
        body = _dense_body(k2d, geom)
        scratch_shapes = [pltpu.VMEM((b, hp, wp), jnp.float32)]

    x_flat = x.reshape(nc, h, w)
    out_flat = pl.pallas_call(
        body,
        out_shape=jax.ShapeDtypeStruct((nc, ho, wo), x.dtype),
        grid=(nc // b,),
        in_specs=[pl.BlockSpec((b, h, w), lambda i: (i, 0, 0))],
        out_specs=pl.BlockSpec((b, ho, wo), lambda i: (i, 0, 0)),
        scratch_shapes=scratch_shapes,
        compiler_params=pltpu.CompilerParams(
            dimension_semantics=("parallel",)),
    )(x_flat)
    return out_flat.reshape(n, c, ho, wo)


class BlurKernel:
    """JAX/Pallas re-implementation of the PyTorch BlurKernel module."""

    def __init__(self, kernel, pad, upsample_factor=1):
        k_in = np.asarray(kernel, dtype=np.float32)
        scale = float(upsample_factor) ** 2
        # 2-D buffer, identical to the PyTorch module's registered buffer.
        self.kernel = make_kernel(kernel) * scale
        self.pad = (int(pad[0]), int(pad[1]))
        if k_in.ndim == 1:
            # make_kernel(k1) == outer(k1/s, k1/s) with s = sum(k1): separable.
            k1 = k_in / k_in.sum()
            self.col_taps = [float(t) for t in (k1 * scale)]
            self.row_taps = [float(t) for t in k1]
        else:
            self.col_taps = None
            self.row_taps = None

    def __call__(self, x):
        return blur_upfirdn2d(x, self.col_taps, self.row_taps, self.kernel,
                              self.pad)


def _reference(x, k2d, pad):
    """Pure-JAX upfirdn2d (up=down=1) reference: pad/crop + conv with flipped taps."""
    pad0, pad1 = pad
    xp = jnp.pad(x, ((0, 0), (0, 0),
                     (max(pad0, 0), max(pad1, 0)),
                     (max(pad0, 0), max(pad1, 0))))
    if pad0 < 0 or pad1 < 0:
        hs, he = max(-pad0, 0), xp.shape[2] - max(-pad1, 0)
        ws, we = max(-pad0, 0), xp.shape[3] - max(-pad1, 0)
        xp = xp[:, :, hs:he, ws:we]
    n, c = x.shape[0], x.shape[1]
    wflip = jnp.flip(jnp.asarray(k2d, jnp.float32), (0, 1))[None, None]
    out = jax.lax.conv_general_dilated(
        xp.reshape(n * c, 1, xp.shape[2], xp.shape[3]),
        wflip, window_strides=(1, 1), padding="VALID",
        precision=jax.lax.Precision.HIGHEST)
    return out.reshape(n, c, out.shape[2], out.shape[3])


if __name__ == "__main__":
    key = jax.random.PRNGKey(0)
    x = jax.random.normal(key, (2, 4, 16, 16), dtype=jnp.float32)

    # 1) typical StyleGAN-style blur: separable [1,3,3,1], pad=(2,1) -> same size
    blur = BlurKernel(kernel=[1, 3, 3, 1], pad=(2, 1), upsample_factor=1)
    out = jax.block_until_ready(blur(x))
    assert out.shape == (2, 4, 16, 16), out.shape
    ref = _reference(x, blur.kernel, blur.pad)
    assert jnp.allclose(out, ref, atol=1e-4, rtol=1e-5), "mismatch (case 1)"

    # 2) negative pad (crop) + upsample_factor scaling
    blur2 = BlurKernel(kernel=[1, 3, 3, 1], pad=(2, -1), upsample_factor=2)
    out2 = jax.block_until_ready(blur2(x))
    ref2 = _reference(x, blur2.kernel, blur2.pad)
    assert out2.shape == ref2.shape
    assert jnp.allclose(out2, ref2, atol=1e-4, rtol=1e-5), "mismatch (case 2)"

    # 3) explicit 2-D (non-separable path) kernel
    blur3 = BlurKernel(kernel=[[1., 2., 1.], [2., 4., 2.], [1., 2., 1.]],
                       pad=(1, 1))
    out3 = jax.block_until_ready(blur3(x))
    ref3 = _reference(x, blur3.kernel, blur3.pad)
    assert out3.shape == (2, 4, 16, 16)
    assert jnp.allclose(out3, ref3, atol=1e-4, rtol=1e-5), "mismatch (case 3)"

    print("KERNEL_OK")
</pallas_src>

<mosaic_0001>
module attributes {stable_mosaic.version = 11 : i64} {
  func.func @kernel(%arg0: i32, %arg1: memref<4x16x16xf32, #tpu.memory_space<vmem>>, %arg2: memref<4x16x16xf32, #tpu.memory_space<vmem>>, %arg3: memref<4x19x19xf32, #tpu.memory_space<vmem>>, %arg4: memref<4x16x19xf32, #tpu.memory_space<vmem>>) attributes {dimension_semantics = [#tpu.dimension_semantics<parallel>], iteration_bounds = array<i64: 2>, scalar_prefetch = 0 : i64, scratch_operands = 2 : i64, tpu.core_type = #tpu.core_type<tc>, window_params = [{transform_indices = @transform_0, window_bounds = array<i64: 4, 16, 16>}, {transform_indices = @transform_1, window_bounds = array<i64: 4, 16, 16>}]} {
    %cst = arith.constant 0.000000e+00 : f32
    %0 = vector.broadcast %cst : f32 to vector<4x19x19xf32>
    %c0 = arith.constant 0 : index
    %c0_0 = arith.constant 0 : index
    %c0_1 = arith.constant 0 : index
    %1 = vector.load %arg3[%c0, %c0_0, %c0_1] : memref<4x19x19xf32, #tpu.memory_space<vmem>>, vector<4x19x19xf32>
    tpu.vector_store %arg3[%c0, %c0_0, %c0_1], %0 {strides = array<i32>} : memref<4x19x19xf32, #tpu.memory_space<vmem>>, vector<4x19x19xf32>,
    %c0_2 = arith.constant 0 : index
    %c0_3 = arith.constant 0 : index
    %c0_4 = arith.constant 0 : index
    %2 = vector.load %arg1[%c0_2, %c0_3, %c0_4] : memref<4x16x16xf32, #tpu.memory_space<vmem>>, vector<4x16x16xf32>
    %c0_5 = arith.constant 0 : index
    %c2 = arith.constant 2 : index
    %c2_6 = arith.constant 2 : index
    %3 = vector.load %arg3[%c0_5, %c2, %c2_6] : memref<4x19x19xf32, #tpu.memory_space<vmem>>, vector<4x16x16xf32>
    tpu.vector_store %arg3[%c0_5, %c2, %c2_6], %2 {strides = array<i32>} : memref<4x19x19xf32, #tpu.memory_space<vmem>>, vector<4x16x16xf32>,
    %c0_7 = arith.constant 0 : index
    %c0_8 = arith.constant 0 : index
    %c0_9 = arith.constant 0 : index
    %4 = vector.load %arg3[%c0_7, %c0_8, %c0_9] : memref<4x19x19xf32, #tpu.memory_space<vmem>>, vector<4x16x19xf32>
    %cst_10 = arith.constant 1.250000e-01 : f32
    %5 = vector.broadcast %cst_10 : f32 to vector<4x16x19xf32>
    %6 = arith.mulf %5, %4 : vector<4x16x19xf32>
    %c0_11 = arith.constant 0 : index
    %c1 = arith.constant 1 : index
    %c0_12 = arith.constant 0 : index
    %7 = vector.load %arg3[%c0_11, %c1, %c0_12] : memref<4x19x19xf32, #tpu.memory_space<vmem>>, vector<4x16x19xf32>
    %cst_13 = arith.constant 3.750000e-01 : f32
    %8 = vector.broadcast %cst_13 : f32 to vector<4x16x19xf32>
    %9 = arith.mulf %8, %7 : vector<4x16x19xf32>
    %10 = arith.addf %6, %9 : vector<4x16x19xf32>
    %c0_14 = arith.constant 0 : index
    %c2_15 = arith.constant 2 : index
    %c0_16 = arith.constant 0 : index
    %11 = vector.load %arg3[%c0_14, %c2_15, %c0_16] : memref<4x19x19xf32, #tpu.memory_space<vmem>>, vector<4x16x19xf32>
    %cst_17 = arith.constant 3.750000e-01 : f32
    %12 = vector.broadcast %cst_17 : f32 to vector<4x16x19xf32>
    %13 = arith.mulf %12, %11 : vector<4x16x19xf32>
    %14 = arith.addf %10, %13 : vector<4x16x19xf32>
    %c0_18 = arith.constant 0 : index
    %c3 = arith.constant 3 : index
    %c0_19 = arith.constant 0 : index
    %15 = vector.load %arg3[%c0_18, %c3, %c0_19] : memref<4x19x19xf32, #tpu.memory_space<vmem>>, vector<4x16x19xf32>
    %cst_20 = arith.constant 1.250000e-01 : f32
    %16 = vector.broadcast %cst_20 : f32 to vector<4x16x19xf32>
    %17 = arith.mulf %16, %15 : vector<4x16x19xf32>
    %18 = arith.addf %14, %17 : vector<4x16x19xf32>
    %c0_21 = arith.constant 0 : index
    %c0_22 = arith.constant 0 : index
    %c0_23 = arith.constant 0 : index
    %19 = vector.load %arg4[%c0_21, %c0_22, %c0_23] : memref<4x16x19xf32, #tpu.memory_space<vmem>>, vector<4x16x19xf32>
    tpu.vector_store %arg4[%c0_21, %c0_22, %c0_23], %18 {strides = array<i32>} : memref<4x16x19xf32, #tpu.memory_space<vmem>>, vector<4x16x19xf32>,
    %c0_24 = arith.constant 0 : index
    %c0_25 = arith.constant 0 : index
    %c0_26 = arith.constant 0 : index
    %20 = vector.load %arg4[%c0_24, %c0_25, %c0_26] : memref<4x16x19xf32, #tpu.memory_space<vmem>>, vector<4x16x16xf32>
    %cst_27 = arith.constant 1.250000e-01 : f32
    %21 = vector.broadcast %cst_27 : f32 to vector<4x16x16xf32>
    %22 = arith.mulf %21, %20 : vector<4x16x16xf32>
    %c0_28 = arith.constant 0 : index
    %c0_29 = arith.constant 0 : index
    %c1_30 = arith.constant 1 : index
    %23 = vector.load %arg4[%c0_28, %c0_29, %c1_30] : memref<4x16x19xf32, #tpu.memory_space<vmem>>, vector<4x16x16xf32>
    %cst_31 = arith.constant 3.750000e-01 : f32
    %24 = vector.broadcast %cst_31 : f32 to vector<4x16x16xf32>
    %25 = arith.mulf %24, %23 : vector<4x16x16xf32>
    %26 = arith.addf %22, %25 : vector<4x16x16xf32>
    %c0_32 = arith.constant 0 : index
    %c0_33 = arith.constant 0 : index
    %c2_34 = arith.constant 2 : index
    %27 = vector.load %arg4[%c0_32, %c0_33, %c2_34] : memref<4x16x19xf32, #tpu.memory_space<vmem>>, vector<4x16x16xf32>
    %cst_35 = arith.constant 3.750000e-01 : f32
    %28 = vector.broadcast %cst_35 : f32 to vector<4x16x16xf32>
    %29 = arith.mulf %28, %27 : vector<4x16x16xf32>
    %30 = arith.addf %26, %29 : vector<4x16x16xf32>
    %c0_36 = arith.constant 0 : index
    %c0_37 = arith.constant 0 : index
    %c3_38 = arith.constant 3 : index
    %31 = vector.load %arg4[%c0_36, %c0_37, %c3_38] : memref<4x16x19xf32, #tpu.memory_space<vmem>>, vector<4x16x16xf32>
    %cst_39 = arith.constant 1.250000e-01 : f32
    %32 = vector.broadcast %cst_39 : f32 to vector<4x16x16xf32>
    %33 = arith.mulf %32, %31 : vector<4x16x16xf32>
    %34 = arith.addf %30, %33 : vector<4x16x16xf32>
    %c0_40 = arith.constant 0 : index
    %c0_41 = arith.constant 0 : index
    %c0_42 = arith.constant 0 : index
    %35 = vector.load %arg2[%c0_40, %c0_41, %c0_42] : memref<4x16x16xf32, #tpu.memory_space<vmem>>, vector<4x16x16xf32>
    tpu.vector_store %arg2[%c0_40, %c0_41, %c0_42], %34 {strides = array<i32>} : memref<4x16x16xf32, #tpu.memory_space<vmem>>, vector<4x16x16xf32>,
    return
  }
  func.func @transform_0(%arg0: i32) -> (i32, i32, i32) {
    %c0_i32 = arith.constant 0 : i32
    %c0_i32_0 = arith.constant 0 : i32
    %c0_i32_1 = arith.constant 0 : i32
    return %arg0, %c0_i32, %c0_i32_0 : i32, i32, i32
  }
  func.func @transform_1(%arg0: i32) -> (i32, i32, i32) {
    %c0_i32 = arith.constant 0 : i32
    %c0_i32_0 = arith.constant 0 : i32
    %c0_i32_1 = arith.constant 0 : i32
    return %arg0, %c0_i32, %c0_i32_0 : i32, i32, i32
  }
}

</mosaic_0001>

<bundles_post_ra>
// kernel: tpu_custom_call.1
= control target key start
LH: loop header
LB: loop body
LE: loop exit
PB: predicated region body
PF: predicated region fallthrough
CT: control target
= control target key end

     0   :  { %6 = vsyncpa [#allocation5], 0  ;;  %s931_s0 = inlined_call_operand.hbm [shape: f32[8,16,16], index: 0, kind: input, shape index: {}]   ;;  %s932_s1 = inlined_call_operand.hbm [shape: f32[8,16,16], index: 1, kind: output, shape index: {}]  }
   0x1   :  { %8 = vsyncpa [#allocation5 + $0x1], 0 }
   0x2   :  { %9 = vsyncpa [#allocation6], 0 }
   0x3   :  { %11 = vsyncpa [#allocation6 + $0x1], 0  ;;  %s720_s6 = smov 0   ;;  %s722_s7 = smov 0  }
   0x4   :  { %s724_s8 = smov 0   ;;  %s726_s9 = smov 0  }
   0x5 LB: > { %s741_s10 = sadd.s32 4294967295, %s697_s9   ;;  %s530_s11 = sadd.s32 4294967294, %s697_s9   ;;  %s697_s9 = sphi %s726_s9, %s947_s9   ;;  %s693_s8 = sphi %s724_s8, %s946_s8   ;;  %s689_s7 = sphi %s722_s7, %s945_s7   ;;  %s685_s6 = sphi %s720_s6, %s944_s6  }
   0x6   : > { %s745_s12 = sadd.s32 1, %s697_s9   ;;  %s24_s13 = sadd.s32 1, %s693_s8 }
   0x7   : > { %s21_s14 = ssub.s32 %s697_s9, %s745_s12  ;;  %p31_p0 = scmp.ne.s32.totalorder %s693_s8, %s689_s7 }
   0x8   : > { %p22_p1 = scmp.eq.s32.totalorder %s21_s14, 0  ;;  %p32_p2 = scmp.eq.s32.totalorder %s697_s9, 0 }
   0x9   : > { %p37_p3 = scmp.ne.s32.totalorder %s689_s7, %s685_s6  ;;  %p38_p4 = scmp.eq.s32.totalorder %s741_s10, 0 }
   0xa   : > { %s757_s15 = scalar_select %p22_p1, %s693_s8, %s24_s13  }
   0xb   : > { %p759_p5 = por %p32_p2, %p31_p0  ;;  %p763_p6 = por %p38_p4, %p37_p3 }
   0xc   : > { %p61_p7 = scmp.eq.s32.totalorder %s741_s10, 1  ;;  %p67_p8 = scmp.eq.s32.totalorder %s530_s11, 1 }
   0xd   : > { %s936_s17 = scalar_select %p763_p6, 1, 0 }
   0xe   : > { %p562_p10 = scmp.lt.s32.totalorder %s697_s9, 2  ;;  %p770_p11 = por %p61_p7, %p31_p0 }
   0xf   : > { %p774_p12 = por %p67_p8, %p37_p3  ;;  %s87_s20 = sand.u32 1, %s693_s8  }
  0x10   : > { %s937_s18 = scalar_select %p770_p11, 1, 0 }
  0x11   : > { %s938_s19 = scalar_select %p774_p12, 1, 0 }
  0x12   : > { %s547_s21 = sshll.u32 %s697_s9, 10  ;;  %s533_s22 = sshll.u32 %s87_s20, 6 }
  0x13   : > { %s783_s25 = scalar_lea.hbm %s931_s0, %s547_s21  ;;  %s91_s26 = scalar_lea.vmem [#allocation4], %s533_s22 }
  0x14   : > { %s99_s27 = sshll.u32 %s91_s26, 4  ;;  %p787_p13 = pnand %p562_p10, %p759_p5  ;;  %s791_s27 = int_to_ptr.vmem [resolvable:$true] %s99_s27 }
  0x15   : > { %s793_s29 = scalar_lea.sflag [#allocation5], %s87_s20  ;;  %s605_s30 = scalar_lea.hbm %s783_s25, 1024 }
  0x16   : > { %p606_p0 = scmp.ne.s32.totalorder %s783_s25, %s605_s30  ;;  %p607_p1 = pneg %p787_p13 }
  0x17   : > { %s610_s4 = scalar_lea.hbm %s931_s0, 2048  ;;  %p611_p4 = scmp.lt.s32.totalorder %s783_s25, %s931_s0 }
  0x18   : > { %p608_p2 = pnand %p607_p1, %p606_p0  ;;  %p612_p5 = scmp.lt.s32.totalorder %s610_s4, %s605_s30 }
  0x1a   : > { %p609_p3 = pneg %p608_p2  ;;  %p613_p7 = por %p612_p5, %p611_p4 }
  0x1c   : > { %p614_p8 = pnand %p613_p7, %p609_p3 }
  0x1e   : > { %617 = shalt.err (!%p614_p8)
}
  0x1f   : > { %s618_s13 = scalar_lea.vmem %s791_s27, 1024  ;;  %s699_s14 = smov [#allocation4]  }
  0x20   : > { %p619_p10 = scmp.ne.s32.totalorder %s791_s27, %s618_s13  ;;  %s623_s16 = sshll.u32 %s699_s14, 4  ;;  %s624_s16 = int_to_ptr.vmem [resolvable:$false] %s623_s16 }
  0x21   : > { %s625_s20 = scalar_lea.vmem %s624_s16, 2048  ;;  %p626_p2 = scmp.lt.s32.totalorder %s791_s27, %s624_s16 }
  0x22   : > { %p621_p9 = pnand %p619_p10, %p607_p1  ;;  %p627_p12 = scmp.lt.s32.totalorder %s625_s20, %s618_s13 }
  0x24   : > { %p622_p0 = pneg %p621_p9  ;;  %p628_p11 = por %p627_p12, %p626_p2 }
  0x26   : > { %p629_p6 = pnand %p628_p11, %p622_p0 }
  0x28   : > { %632 = shalt.err (!%p629_p6)
}
  0x29   : > { %s700_s21 = smov 128   ;;  %s701_s22 = smov 8  }
  0x2a   : > { %557 = dma.hbm_to_vmem [thread:$0]  (!%p787_p13), %s783_s25, 1024, %s791_s27, %s793_s29, %s700_s21, %s700_s21, %s701_s22  }
  0x2b   : > { %p537_p9 = scmp.ge.s32.totalorder %s697_s9, 1  ;;  %p107_p1 = scmp.lt.s32.totalorder %s697_s9, 3 }
  0x2d   : > { %p108_p3 = pnand %p537_p9, %p107_p1 }
  0x2e   : > { %s817_s23 = sand.u32 (!%p108_p3), 1, %s689_s7   ;;  %p940_p6 = scmp.ne.s32.totalorder (!%p108_p3), %s936_s17, 0 }
  0x2f   : > { %111 = sbr.rel (%p108_p3) target bundleno = 376 (0x178), region = 24  ;;  %s538_s24 = sshll.u32 (!%p108_p3), %s817_s23, 6 }
  0x30   : > { %s114_s26 = scalar_lea.sflag (!%p108_p3), [#allocation5], %s817_s23  ;;  %s823_s30 = scalar_lea.vmem (!%p108_p3), [#allocation4], %s538_s24 }
  0x34   : > { %676 = dma.done.wait (%p940_p6), %s114_s26, 1024  }
  0x35   : > { %678 = vsyncadd (%p940_p6), %s114_s26, 4294966272  ;;  %vm138_vm0 = vcmask 154624   ;;  %vm141_vm1 = vcmask 149504   ;;  %v702_v0 = vmov 0.0   ;;  %v154_v1 = vld [vmem:[%s823_s30 + $0x10] sm:$0xff]  ;;  %v152_v2 = vld [vmem:[%s823_s30] sm:$0xff] }
  0x36   : > { %143 = vst.msk [vmem:[#allocation2 + $0x18] sm:$0xff] %vm138_vm0, %v702_v0  ;;  %144 = vst.msk [vmem:[#allocation2 + $0x20] sm:$0xff] %vm138_vm0, %v702_v0  ;;  %s703_s17 = smov 2   ;;  %v155_v3 = vld [vmem:[%s823_s30 + $0x18] sm:$0xff]  ;;  %v153_v4 = vld [vmem:[%s823_s30 + $0x8] sm:$0xff]  ;;  %vm192_vm2 = vcmask 146448  }
  0x37   : > { %139 = vst.msk [vmem:[#allocation2] sm:$0xff] %vm138_vm0, %v702_v0  ;;  %140 = vst.msk [vmem:[#allocation2 + $0x8] sm:$0xff] %vm138_vm0, %v702_v0  ;;  %172 = vrot.lane.b32.xlu1 %v154_v1, %s703_s17  ;;  %168 = vrot.lane.b32.xlu0 %v152_v2, %s703_s17  ;;  %v157_v5 = vld [vmem:[%s823_s30 + $0x28] sm:$0xff]  ;;  %v156_v6 = vld [vmem:[%s823_s30 + $0x20] sm:$0xff]  ;;  %s704_s25 = smov 127   ;;  %s705_s27 = smov 126  }
  0x38   : > { %146 = vst.msk [vmem:[#allocation2 + $0x30] sm:$0xff] %vm138_vm0, %v702_v0  ;;  %147 = vst.msk [vmem:[#allocation2 + $0x38] sm:$0xff] %vm138_vm0, %v702_v0  ;;  %v159_v7 = vld [vmem:[%s823_s30 + $0x38] sm:$0xff]  ;;  %v158_v8 = vld [vmem:[%s823_s30 + $0x30] sm:$0xff]  ;;  %s706_s28 = smov 125   ;;  %vm433_vm3 = vcmask 130048  }
  0x39   : > { %149 = vst.msk [vmem:[#allocation2 + $0x48] sm:$0xff] %vm138_vm0, %v702_v0  ;;  %150 = vst.msk [vmem:[#allocation2 + $0x50] sm:$0xff] %vm138_vm0, %v702_v0  ;;  %s863_s29 = scalar_lea.vmem [#allocation7], %s538_s24  ;;  %s549_s2 = sshll.u32 %s741_s10, 10 }
  0x3a   : > { %145 = vst.msk [vmem:[#allocation2 + $0x28] sm:$0x7] %vm141_vm1, %v702_v0  ;;  %142 = vst.msk [vmem:[#allocation2 + $0x10] sm:$0x7] %vm141_vm1, %v702_v0  ;;  %s457_s3 = sshll.u32 %s863_s29, 4  ;;  %s884_s11 = scalar_lea.hbm %s932_s1, %s549_s2  ;;  %s886_s3 = int_to_ptr.vmem [resolvable:$true] %s457_s3 }
  0x3b   : > { %148 = vst.msk [vmem:[#allocation2 + $0x40] sm:$0x7] %vm141_vm1, %v702_v0  ;;  %151 = vst.msk [vmem:[#allocation2 + $0x58] sm:$0x7] %vm141_vm1, %v702_v0  ;;  %174 = vrot.lane.b32.xlu1 %v155_v3, %s703_s17  ;;  %170 = vrot.lane.b32.xlu0 %v153_v4, %s703_s17  ;;  %s443_s10 = scalar_lea.sflag [#allocation6], %s817_s23  ;;  %s633_s13 = scalar_lea.vmem %s886_s3, 1024 }
  0x3c   : > { %p634_p11 = scmp.ne.s32.totalorder %s886_s3, %s633_s13  ;;  %p941_p12 = scmp.ne.s32.totalorder %s937_s18, 0 }
  0x3d   : > { %s707_s14 = smov [#allocation7]  }
  0x3e   : > { %p635_p13 = pnand %p634_p11, %p941_p12  ;;  %s637_s16 = sshll.u32 %s707_s14, 4  ;;  %s638_s16 = int_to_ptr.vmem [resolvable:$false] %s637_s16 }
  0x3f   : > { %178 = vrot.lane.b32.xlu1 %v157_v5, %s703_s17  ;;  %176 = vrot.lane.b32.xlu0 %v156_v6, %s703_s17  ;;  %s639_s20 = scalar_lea.vmem %s638_s16, 2048  ;;  %p640_p5 = scmp.lt.s32.totalorder %s886_s3, %s638_s16 }
  0x40   : > { %p636_p4 = pneg %p635_p13  ;;  %p641_p7 = scmp.lt.s32.totalorder %s639_s20, %s633_s13 }
  0x42   : > { %p642_p8 = por %p641_p7, %p640_p5 }
  0x43   : > { %182 = vrot.lane.b32.xlu1 %v159_v7, %s703_s17  ;;  %180 = vrot.lane.b32.xlu0 %v158_v8, %s703_s17 }
  0x44   : > { %p643_p10 = pnand %p642_p8, %p636_p4 }
  0xa9   : > { %v173_v9 = vpop.permute.xlu1 %172  ;;  %v169_v10 = vpop.permute.xlu0 %168 }
  0xaa   : > { %195 = vst.msk [vmem:[#allocation2 + $0x1a] sm:$0xff] %vm192_vm2, %v173_v9  ;;  %193 = vst.msk [vmem:[#allocation2 + $0x2] sm:$0xff] %vm192_vm2, %v169_v10 }
  0xad   : > { %v175_v11 = vpop.permute.xlu1 %174  ;;  %v171_v12 = vpop.permute.xlu0 %170 }
  0xae   : > { %196 = vst.msk [vmem:[#allocation2 + $0x22] sm:$0xff] %vm192_vm2, %v175_v11  ;;  %194 = vst.msk [vmem:[#allocation2 + $0xa] sm:$0xff] %vm192_vm2, %v171_v12 }
  0xb1   : > { %v203_v13 = vld [vmem:[#allocation2 + $0x18] sm:$0xff]  ;;  %v179_v16 = vpop.permute.xlu1 %178  ;;  %v177_v17 = vpop.permute.xlu0 %176  ;;  %v201_v21 = vld [vmem:[#allocation2] sm:$0xff] }
  0xb2   : > { %v219_v14 = vld [vmem:[#allocation2 + $0x19] sm:$0xff]  ;;  %v211_v18 = vmul.f32 0.125, %v203_v13  ;;  %v217_v22 = vld [vmem:[#allocation2 + $0x1] sm:$0xff]  ;;  %198 = vst.msk [vmem:[#allocation2 + $0x3a] sm:$0xff] %vm192_vm2, %v179_v16  ;;  %197 = vst.msk [vmem:[#allocation2 + $0x32] sm:$0xff] %vm192_vm2, %v177_v17  ;;  %v209_v24 = vmul.f32 0.125, %v201_v21 }
  0xb3   : > { %v243_v15 = vld [vmem:[#allocation2 + $0x1a] sm:$0xff]  ;;  %v227_v19 = vmul.f32 0.375, %v219_v14  ;;  %v241_v23 = vld [vmem:[#allocation2 + $0x2] sm:$0xff]  ;;  %v225_v25 = vmul.f32 0.375, %v217_v22 }
  0xb4   : > { %v251_v20 = vmul.f32 0.375, %v243_v15  ;;  %v249_v28 = vmul.f32 0.375, %v241_v23 }
  0xb5   : > { %v235_v26 = vadd.f32 %v227_v19, %v211_v18  ;;  %v233_v27 = vadd.f32 %v225_v25, %v209_v24  ;;  %v204_v29 = vld [vmem:[#allocation2 + $0x20] sm:$0xff]  ;;  %v183_v32 = vpop.permute.xlu1 %182  ;;  %v181_v33 = vpop.permute.xlu0 %180  ;;  %v202_v40 = vld [vmem:[#allocation2 + $0x8] sm:$0xff] }
  0xb6   : > { %v220_v30 = vld [vmem:[#allocation2 + $0x21] sm:$0xff]  ;;  %v212_v35 = vmul.f32 0.125, %v204_v29  ;;  %200 = vst.msk [vmem:[#allocation2 + $0x52] sm:$0xff] %vm192_vm2, %v183_v32  ;;  %199 = vst.msk [vmem:[#allocation2 + $0x4a] sm:$0xff] %vm192_vm2, %v181_v33  ;;  %v210_v43 = vmul.f32 0.125, %v202_v40  ;;  %v218_v44 = vld [vmem:[#allocation2 + $0x9] sm:$0xff] }
  0xb7   : > { %v244_v31 = vld [vmem:[#allocation2 + $0x22] sm:$0xff]  ;;  %v259_v34 = vadd.f32 %v251_v20, %v235_v26  ;;  %v228_v36 = vmul.f32 0.375, %v220_v30  ;;  %v257_v41 = vadd.f32 %v249_v28, %v233_v27  ;;  %v242_v45 = vld [vmem:[#allocation2 + $0xa] sm:$0xff]  ;;  %v226_v49 = vmul.f32 0.375, %v218_v44 }
  0xb8   : > { %v252_v37 = vmul.f32 0.375, %v244_v31  ;;  %v267_v38 = vld [vmem:[#allocation2 + $0x1b] sm:$0xff]  ;;  %v268_v39 = vld [vmem:[#allocation2 + $0x23] sm:$0xff]  ;;  %v266_v50 = vld [vmem:[#allocation2 + $0xb] sm:$0xff]  ;;  %v250_v53 = vmul.f32 0.375, %v242_v45 }
  0xb9   : > { %v275_v42 = vmul.f32 0.125, %v267_v38  ;;  %v265_v46 = vld [vmem:[#allocation2 + $0x3] sm:$0xff]  ;;  %v236_v47 = vadd.f32 %v228_v36, %v212_v35  ;;  %v276_v48 = vmul.f32 0.125, %v268_v39  ;;  %v246_v54 = vld [vmem:[#allocation2 + $0x3a] sm:$0xff]  ;;  %v205_v56 = vld [vmem:[#allocation2 + $0x30] sm:$0xff]  ;;  %v234_v58 = vadd.f32 %v226_v49, %v210_v43 }
  0xba   : > { %v273_v51 = vmul.f32 0.125, %v265_v46  ;;  %v270_v55 = vld [vmem:[#allocation2 + $0x3b] sm:$0xff]  ;;  %v274_v59 = vmul.f32 0.125, %v266_v50  ;;  %v221_v62 = vld [vmem:[#allocation2 + $0x31] sm:$0xff]  ;;  %v254_v0 = vmul.f32 0.375, %v246_v54  ;;  %v213_v1 = vmul.f32 0.125, %v205_v56 }
  0xbb   : > { %v283_v52 = vadd.f32 %v275_v42, %v259_v34  ;;  %v260_v57 = vadd.f32 %v252_v37, %v236_v47  ;;  %v206_v61 = vld [vmem:[#allocation2 + $0x38] sm:$0xff]  ;;  %v229_v3 = vmul.f32 0.375, %v221_v62  ;;  %v258_v7 = vadd.f32 %v250_v53, %v234_v58 }
  0xbc   : > { %v281_v60 = vadd.f32 %v273_v51, %v257_v41  ;;  %v222_v63 = vld [vmem:[#allocation2 + $0x39] sm:$0xff]  ;;  %v214_v2 = vmul.f32 0.125, %v206_v61  ;;  %v278_v15 = vmul.f32 0.125, %v270_v55 }
  0xbd   : > { %291 = vst.msk [vmem:[#allocation3 + $0x10] sm:$0xff] %vm138_vm0, %v283_v52  ;;  %v245_v4 = vld [vmem:[#allocation2 + $0x32] sm:$0xff]  ;;  %v284_v6 = vadd.f32 %v276_v48, %v260_v57  ;;  %v230_v8 = vmul.f32 0.375, %v222_v63  ;;  %v237_v10 = vadd.f32 %v229_v3, %v213_v1  ;;  %v207_v13 = vld [vmem:[#allocation2 + $0x48] sm:$0xff]  ;;  %v282_v14 = vadd.f32 %v274_v59, %v258_v7 }
  0xbe   : > { %v269_v5 = vld [vmem:[#allocation2 + $0x33] sm:$0xff]  ;;  %289 = vst.msk [vmem:[#allocation3] sm:$0xff] %vm138_vm0, %v281_v60  ;;  %v253_v9 = vmul.f32 0.375, %v245_v4  ;;  %v223_v18 = vld [vmem:[#allocation2 + $0x49] sm:$0xff]  ;;  %v215_v22 = vmul.f32 0.125, %v207_v13 }
  0xbf   : > { %v277_v11 = vmul.f32 0.125, %v269_v5  ;;  %v248_v12 = vld [vmem:[#allocation2 + $0x52] sm:$0xff]  ;;  %292 = vst.msk [vmem:[#allocation3 + $0x18] sm:$0xff] %vm138_vm0, %v284_v6  ;;  %v238_v16 = vadd.f32 %v230_v8, %v214_v2  ;;  %v231_v24 = vmul.f32 0.375, %v223_v18  ;;  %v247_v25 = vld [vmem:[#allocation2 + $0x4a] sm:$0xff]  ;;  %290 = vst.msk [vmem:[#allocation3 + $0x8] sm:$0xff] %vm138_vm0, %v282_v14 }
  0xc0   : > { %v208_v17 = vld [vmem:[#allocation2 + $0x50] sm:$0xff]  ;;  %v261_v20 = vadd.f32 %v253_v9, %v237_v10  ;;  %v256_v28 = vmul.f32 0.375, %v248_v12  ;;  %v255_v30 = vmul.f32 0.375, %v247_v25 }
  0xc1   : > { %v224_v19 = vld [vmem:[#allocation2 + $0x51] sm:$0xff]  ;;  %v216_v23 = vmul.f32 0.125, %v208_v17  ;;  %v262_v27 = vadd.f32 %v254_v0, %v238_v16  ;;  %v239_v32 = vadd.f32 %v231_v24, %v215_v22 }
  0xc2   : > { %v272_v21 = vld [vmem:[#allocation2 + $0x53] sm:$0xff]  ;;  %v271_v26 = vld [vmem:[#allocation2 + $0x4b] sm:$0xff]  ;;  %v232_v29 = vmul.f32 0.375, %v224_v19  ;;  %v285_v31 = vadd.f32 %v277_v11, %v261_v20 }
  0xc3   : > { %v279_v33 = vmul.f32 0.125, %v271_v26  ;;  %v280_v34 = vmul.f32 0.125, %v272_v21  ;;  %v286_v36 = vadd.f32 %v278_v15, %v262_v27  ;;  %v263_v37 = vadd.f32 %v255_v30, %v239_v32 }
  0xc4   : > { %v240_v35 = vadd.f32 %v232_v29, %v216_v23  ;;  %293 = vst.msk [vmem:[#allocation3 + $0x20] sm:$0xff] %vm138_vm0, %v285_v31  ;;  %v299_v42 = vld [vmem:[#allocation3 + $0x10] sm:$0xff] }
  0xc5   : > { %v297_v38 = vld [vmem:[#allocation3] sm:$0xff]  ;;  %294 = vst.msk [vmem:[#allocation3 + $0x28] sm:$0xff] %vm138_vm0, %v286_v36  ;;  %v287_v41 = vadd.f32 %v279_v33, %v263_v37  ;;  %v315_v46 = vmul.f32 0.375, %v299_v42  ;;  %v307_v59 = vmul.f32 0.125, %v299_v42 }
  0xc6   : > { %v264_v39 = vadd.f32 %v256_v28, %v240_v35  ;;  %v313_v40 = vmul.f32 0.375, %v297_v38  ;;  %v298_v44 = vld [vmem:[#allocation3 + $0x8] sm:$0xff]  ;;  %v300_v47 = vld [vmem:[#allocation3 + $0x18] sm:$0xff]  ;;  %v305_v57 = vmul.f32 0.125, %v297_v38 }
  0xc7   : > { %295 = vst.msk [vmem:[#allocation3 + $0x30] sm:$0xff] %vm138_vm0, %v287_v41  ;;  %v314_v45 = vmul.f32 0.375, %v298_v44  ;;  %v316_v50 = vmul.f32 0.375, %v300_v47  ;;  %v306_v58 = vmul.f32 0.125, %v298_v44  ;;  %v308_v60 = vmul.f32 0.125, %v300_v47 }
  0xc8   : > { %329 = vrot.lane.b32.xlu0 %v313_v40, %s704_s25  ;;  %v288_v43 = vadd.f32 %v280_v34, %v264_v39 }
  0xc9   : > { %331 = vrot.lane.b32.xlu1 %v314_v45, %s704_s25 }
  0xca   : > { %296 = vst.msk [vmem:[#allocation3 + $0x38] sm:$0xff] %vm138_vm0, %v288_v43 }
  0xcb   : > { %v301_v48 = vld [vmem:[#allocation3 + $0x20] sm:$0xff] }
  0xcc   : > { %333 = vrot.lane.b32.xlu0 %v315_v46, %s704_s25  ;;  %v317_v49 = vmul.f32 0.375, %v301_v48  ;;  %v302_v51 = vld [vmem:[#allocation3 + $0x28] sm:$0xff]  ;;  %v309_v61 = vmul.f32 0.125, %v301_v48 }
  0xcd   : > { %335 = vrot.lane.b32.xlu1 %v316_v50, %s704_s25  ;;  %v318_v54 = vmul.f32 0.375, %v302_v51  ;;  %v310_v62 = vmul.f32 0.125, %v302_v51 }
  0xce   : > { %v303_v52 = vld [vmem:[#allocation3 + $0x30] sm:$0xff] }
  0xcf   : > { %v319_v53 = vmul.f32 0.375, %v303_v52  ;;  %v311_v63 = vmul.f32 0.125, %v303_v52 }
  0xd0   : > { %337 = vrot.lane.b32.xlu0 %v317_v49, %s704_s25 }
  0xd1   : > { %v304_v55 = vld [vmem:[#allocation3 + $0x38] sm:$0xff]  ;;  %339 = vrot.lane.b32.xlu1 %v318_v54, %s704_s25 }
  0xd2   : > { %v320_v56 = vmul.f32 0.375, %v304_v55  ;;  %v312_v0 = vmul.f32 0.125, %v304_v55 }
  0xd4   : > { %341 = vrot.lane.b32.xlu0 %v319_v53, %s704_s25 }
  0xd5   : > { %343 = vrot.lane.b32.xlu1 %v320_v56, %s704_s25 }
  0xd8   : > { %361 = vrot.lane.b32.xlu0 %v313_v40, %s705_s27 }
  0xd9   : > { %363 = vrot.lane.b32.xlu1 %v314_v45, %s705_s27 }
  0xdc   : > { %365 = vrot.lane.b32.xlu0 %v315_v46, %s705_s27 }
  0xdd   : > { %367 = vrot.lane.b32.xlu1 %v316_v50, %s705_s27 }
  0xe0   : > { %369 = vrot.lane.b32.xlu0 %v317_v49, %s705_s27 }
  0xe1   : > { %371 = vrot.lane.b32.xlu1 %v318_v54, %s705_s27 }
  0xe4   : > { %373 = vrot.lane.b32.xlu0 %v319_v53, %s705_s27 }
  0xe5   : > { %375 = vrot.lane.b32.xlu1 %v320_v56, %s705_s27 }
  0xe8   : > { %401 = vrot.lane.b32.xlu0 %v305_v57, %s706_s28 }
  0xe9   : > { %403 = vrot.lane.b32.xlu1 %v306_v58, %s706_s28 }
  0xec   : > { %405 = vrot.lane.b32.xlu0 %v307_v59, %s706_s28 }
  0xed   : > { %407 = vrot.lane.b32.xlu1 %v308_v60, %s706_s28 }
  0xf0   : > { %409 = vrot.lane.b32.xlu0 %v309_v61, %s706_s28 }
  0xf1   : > { %411 = vrot.lane.b32.xlu1 %v310_v62, %s706_s28 }
  0xf4   : > { %413 = vrot.lane.b32.xlu0 %v311_v63, %s706_s28 }
  0xf5   : > { %415 = vrot.lane.b32.xlu1 %v312_v0, %s706_s28 }
 0x13a   : > { %v330_v1 = vpop.permute.xlu0 %329 }
 0x13b   : > { %v332_v2 = vpop.permute.xlu1 %331  ;;  %v353_v16 = vadd.f32 %v330_v1, %v305_v57 }
 0x13c   : > { %v354_v20 = vadd.f32 %v332_v2, %v306_v58 }
 0x13e   : > { %v334_v3 = vpop.permute.xlu0 %333 }
 0x13f   : > { %v336_v4 = vpop.permute.xlu1 %335  ;;  %v355_v21 = vadd.f32 %v334_v3, %v307_v59 }
 0x140   : > { %v356_v27 = vadd.f32 %v336_v4, %v308_v60 }
 0x142   : > { %v338_v5 = vpop.permute.xlu0 %337 }
 0x143   : > { %v340_v6 = vpop.permute.xlu1 %339  ;;  %v357_v28 = vadd.f32 %v338_v5, %v309_v61 }
 0x144   : > { %v358_v35 = vadd.f32 %v340_v6, %v310_v62 }
 0x146   : > { %v342_v7 = vpop.permute.xlu0 %341 }
 0x147   : > { %v344_v8 = vpop.permute.xlu1 %343  ;;  %v359_v36 = vadd.f32 %v342_v7, %v311_v63 }
 0x148   : > { %v360_v43 = vadd.f32 %v344_v8, %v312_v0 }
 0x14a   : > { %v362_v9 = vpop.permute.xlu0 %361 }
 0x14b   : > { %v364_v10 = vpop.permute.xlu1 %363  ;;  %v385_v17 = vadd.f32 %v362_v9, %v353_v16 }
 0x14c   : > { %v386_v23 = vadd.f32 %v364_v10, %v354_v20 }
 0x14e   : > { %v366_v11 = vpop.permute.xlu0 %365 }
 0x14f   : > { %v368_v12 = vpop.permute.xlu1 %367  ;;  %v387_v24 = vadd.f32 %v366_v11, %v355_v21 }
 0x150   : > { %v388_v31 = vadd.f32 %v368_v12, %v356_v27 }
 0x152   : > { %v370_v13 = vpop.permute.xlu0 %369 }
 0x153   : > { %v372_v14 = vpop.permute.xlu1 %371  ;;  %v389_v32 = vadd.f32 %v370_v13, %v357_v28 }
 0x154   : > { %v390_v39 = vadd.f32 %v372_v14, %v358_v35 }
 0x156   : > { %v374_v15 = vpop.permute.xlu0 %373 }
 0x157   : > { %v376_v18 = vpop.permute.xlu1 %375  ;;  %v391_v40 = vadd.f32 %v374_v15, %v359_v36 }
 0x158   : > { %v392_v46 = vadd.f32 %v376_v18, %v360_v43 }
 0x15a   : > { %v402_v19 = vpop.permute.xlu0 %401 }
 0x15b   : > { %v425_v22 = vadd.f32 %v402_v19, %v385_v17  ;;  %v404_v25 = vpop.permute.xlu1 %403 }
 0x15c   : > { %v426_v29 = vadd.f32 %v404_v25, %v386_v23 }
 0x15d   : > { %434 = vst.msk [vmem:[%s863_s29] sm:$0xff] %vm433_vm3, %v425_v22 }
 0x15e   : > { %v406_v26 = vpop.permute.xlu0 %405  ;;  %435 = vst.msk [vmem:[%s863_s29 + $0x8] sm:$0xff] %vm433_vm3, %v426_v29 }
 0x15f   : > { %v427_v30 = vadd.f32 %v406_v26, %v387_v24  ;;  %v408_v33 = vpop.permute.xlu1 %407 }
 0x160   : > { %v428_v37 = vadd.f32 %v408_v33, %v388_v31 }
 0x161   : > { %436 = vst.msk [vmem:[%s863_s29 + $0x10] sm:$0xff] %vm433_vm3, %v427_v30 }
 0x162   : > { %v410_v34 = vpop.permute.xlu0 %409  ;;  %437 = vst.msk [vmem:[%s863_s29 + $0x18] sm:$0xff] %vm433_vm3, %v428_v37 }
 0x163   : > { %v429_v38 = vadd.f32 %v410_v34, %v389_v32  ;;  %v412_v41 = vpop.permute.xlu1 %411 }
 0x164   : > { %v430_v44 = vadd.f32 %v412_v41, %v390_v39 }
 0x165   : > { %438 = vst.msk [vmem:[%s863_s29 + $0x20] sm:$0xff] %vm433_vm3, %v429_v38 }
 0x166   : > { %v414_v42 = vpop.permute.xlu0 %413  ;;  %439 = vst.msk [vmem:[%s863_s29 + $0x28] sm:$0xff] %vm433_vm3, %v430_v44 }
 0x167   : > { %v431_v45 = vadd.f32 %v414_v42, %v391_v40  ;;  %v416_v47 = vpop.permute.xlu1 %415 }
 0x168   : > { %v432_v48 = vadd.f32 %v416_v47, %v392_v46 }
 0x169   : > { %440 = vst.msk [vmem:[%s863_s29 + $0x30] sm:$0xff] %vm433_vm3, %v431_v45 }
 0x16a   : > { %441 = vst.msk [vmem:[%s863_s29 + $0x38] sm:$0xff] %vm433_vm3, %v432_v48 }
 0x16b   : > { %646 = shalt.err (!%p643_p10)
}
 0x16c   : > { %s647_s21 = scalar_lea.hbm %s884_s11, 1024  ;;  %s651_s26 = scalar_lea.hbm %s932_s1, 2048 }
 0x16d   : > { %p648_p0 = scmp.ne.s32.totalorder %s884_s11, %s647_s21  ;;  %p652_p1 = scmp.lt.s32.totalorder %s884_s11, %s932_s1 }
 0x16e   : > { %p653_p3 = scmp.lt.s32.totalorder %s651_s26, %s647_s21 }
 0x16f   : > { %p649_p2 = pnand %p648_p0, %p941_p12 }
 0x170   : > { %p654_p6 = por %p653_p3, %p652_p1 }
 0x171   : > { %p650_p9 = pneg %p649_p2 }
 0x173   : > { %p655_p11 = pnand %p654_p6, %p650_p9 }
 0x175   : > { %658 = shalt.err (!%p655_p11)
}
 0x176   : > { %s708_s25 = smov 128   ;;  %s709_s27 = smov 8  }
 0x177   : > { %552 = dma.vmem_to_hbm [thread:$0]  (%p941_p12), %s886_s3, 1024, %s884_s11, %s443_s10, %s708_s25, %s708_s25, %s709_s27  }
 0x178 PF: > { %s472_s28 = sand.u32 1, %s685_s6   ;;  %p942_p13 = scmp.ne.s32.totalorder %s938_s19, 0 }
 0x179   : > { %p943_p4 = scmp.ge.s32.totalorder %s697_s9, 2  ;;  %s473_s29 = scalar_lea.sflag [#allocation6], %s472_s28 }
 0x17b   : > { %p559_p5 = pnand %p943_p4, %p942_p13 }
 0x17d   : > { %p560_p7 = pneg %p559_p5 }
 0x17f   : > { %680 = dma.done.wait (%p560_p7), %s473_s29, 1024  }
 0x180   : > { %682 = vsyncadd (%p560_p7), %s473_s29, 4294966272  ;;  %p14_p8 = scmp.ge.s32.totalorder %s745_s12, 4   ;;  %s944_s6 = smov %s689_s7 }
 0x181   : > { %s945_s7 = smov %s693_s8  ;;  %s946_s8 = smov %s757_s15 }
 0x182   : > { %s947_s9 = smov %s745_s12  ;;  %16 = sbr.rel (!%p14_p8) target bundleno = 5 (0x5), region = 69 }
 0x187   :  { %478 = vsyncpa [#allocation5], 1 }
 0x188   :  { %480 = vsyncpa [#allocation5 + $0x1], 1 }
 0x189   :  { %481 = vsyncpa [#allocation6], 1 }
 0x18a   :  { %483 = vsyncpa [#allocation6 + $0x1], 1 }

</bundles_post_ra>
